<compile_context>
chip_gen: v5e
topology: v5e:2x2
jax: 0.10.0
libtpu: 0.0.40
codegen_flags: <defaults>
</compile_context>

<pallas_src>
import functools

import jax
import jax.numpy as jnp
from jax.experimental import pallas as pl
from jax.experimental.pallas import tpu as pltpu

ALPHA = 0.75
NUM_CLASSES = 4            # K = NUM_CLASSES - 1 = 3 ordinal thresholds
K = NUM_CLASSES - 1
PACK_ROWS = 2 * (K + 1)    # 8 f32 sublane rows = 2 samples per lane column


def _focal_ordinal_kernel(p_ref, out_ref, *, alpha, b_true, tb, ragged):
    """p_ref: (8, TB) packed f32 block.

    Rows 0..2 = logits of sample 2c, row 3 = float(label) of sample 2c,
    rows 4..6 = logits of sample 2c+1, row 7 = float(label) of sample 2c+1,
    where c is the global packed-column index.

    out_ref: (1, 1, 128) f32 per-block partials; lane 0 = sum_q, lane 1 = sum_bce.
    """
    i = pl.program_id(0)

    def group(x, y_f):
        # x: (K, TB) raw logits, y_f: (1, TB) float-coded integer labels (exact).
        row = jax.lax.broadcasted_iota(jnp.int32, x.shape, 0).astype(jnp.float32)
        mask = row < y_f                                    # levels[j, c] = (j < y[c])
        one_m_x = 1.0 - x
        focal_w = jnp.where(mask, one_m_x * one_m_x, x * x)
        q = jnp.max(focal_w, axis=0, keepdims=True)         # (1, TB)
        # log(sigmoid(x)) = x - softplus(x);  log(1 - sigmoid(x)) = -softplus(x)
        sp = jnp.maximum(x, 0.0) + jnp.log1p(jnp.exp(-jnp.abs(x)))
        bce = jnp.where(mask, alpha * (sp - x), (1.0 - alpha) * sp)
        return q, jnp.sum(bce, axis=0, keepdims=True)       # (1, TB), (1, TB)

    q_top, bce_top = group(p_ref[0:K, :], p_ref[K:K + 1, :])
    q_bot, bce_bot = group(p_ref[K + 1:2 * K + 1, :], p_ref[2 * K + 1:2 * K + 2, :])

    if ragged:
        # Global sample index of the "top" sample in each packed column.
        s_top = 2 * (jax.lax.broadcasted_iota(jnp.int32, (1, tb), 1) + i * tb)
        valid_top = s_top < b_true
        valid_bot = (s_top + 1) < b_true
        q_top = jnp.where(valid_top, q_top, 0.0)
        bce_top = jnp.where(valid_top, bce_top, 0.0)
        q_bot = jnp.where(valid_bot, q_bot, 0.0)
        bce_bot = jnp.where(valid_bot, bce_bot, 0.0)

    q_sum = jnp.sum(q_top + q_bot)
    bce_sum = jnp.sum(bce_top + bce_bot)

    lane = jax.lax.broadcasted_iota(jnp.int32, (1, 1, 128), 2)
    out_ref[...] = jnp.where(lane == 0, q_sum, jnp.where(lane == 1, bce_sum, 0.0))


def focal_ordinal_loss(x, y, *, alpha=ALPHA, block_cols=32768):
    """x: (B, 3) float logits, y: (B,) integer labels in [0, NUM_CLASSES)."""
    B, k = x.shape
    assert k == K, f"kernel is specialized to num_classes={NUM_CLASSES} (K={K})"
    # TODO(synk): general num_classes would need a different sublane packing.

    # Single fused relayout: cast, append the label as a 4th column, pair samples
    # (two per packed column), transpose to the lane-dense (8, B/2) layout.
    xf = x.astype(jnp.float32)
    yf = y.astype(jnp.float32).reshape(B, 1)        # exact for small integer labels
    packed = jnp.concatenate([xf, yf], axis=1)      # (B, 4)
    if B % 2:
        packed = jnp.concatenate(
            [packed, jnp.zeros((1, K + 1), jnp.float32)], axis=0)
    b_half = packed.shape[0] // 2
    packed = packed.reshape(b_half, PACK_ROWS).T    # (8, b_half)

    if b_half <= block_cols:
        tb = b_half                                  # single full-extent block
    else:
        tb = max(128, (block_cols // 128) * 128)     # lane constraint when tiling
    grid = (pl.cdiv(b_half, tb),)
    ragged = (B % 2 != 0) or (b_half % tb != 0)

    kernel = functools.partial(
        _focal_ordinal_kernel, alpha=float(alpha), b_true=B, tb=tb, ragged=ragged)

    partials = pl.pallas_call(
        kernel,
        out_shape=jax.ShapeDtypeStruct((grid[0], 1, 128), jnp.float32),
        grid=grid,
        in_specs=[pl.BlockSpec((PACK_ROWS, tb), lambda i: (0, i))],
        out_specs=pl.BlockSpec((1, 1, 128), lambda i: (i, 0, 0)),
        compiler_params=pltpu.CompilerParams(
            dimension_semantics=("parallel",)),
    )(packed)

    sum_q = jnp.sum(partials[:, 0, 0])
    sum_bce = jnp.sum(partials[:, 0, 1])
    return (sum_q / jnp.float32(B)) * sum_bce

# TODO(synk): pooling=True branch (MaxPool1d(3,1,padding=1) over q) not
# implemented; the module's default is pooling=False.


def _reference(x, y, alpha=ALPHA):
    """Pure-JAX reference mirroring the PyTorch forward (pooling=False)."""
    B, k = x.shape
    xf = x.astype(jnp.float32)
    col = jnp.arange(k)[None, :]
    levels = (col < y[:, None]).astype(jnp.float32)
    q = jnp.max(levels * (1 - xf) ** 2 + (1 - levels) * xf ** 2, axis=1)
    sx = jax.nn.sigmoid(xf)
    s = jnp.sum(-alpha * levels * jnp.log(sx)
                - (1 - alpha) * (1 - levels) * jnp.log(1 - sx))
    return jnp.mean(q * s)


if __name__ == "__main__":
    key = jax.random.PRNGKey(0)
    kx, ky, kx2, ky2 = jax.random.split(key, 4)

    # Small shape consistent with the module: batch=8, K=3 ordinal thresholds.
    B = 8
    x = jax.random.normal(kx, (B, K), dtype=jnp.float32)
    y = jax.random.randint(ky, (B,), 0, NUM_CLASSES, dtype=jnp.int32)
    loss = focal_ordinal_loss(x, y)
    jax.block_until_ready(loss)
    ref = _reference(x, y)
    assert jnp.allclose(loss, ref, rtol=1e-5, atol=1e-5), (loss, ref)

    # Exercise the tiled + ragged path: odd batch (one padded packed column),
    # two 128-column blocks with a partial last block.
    B2 = 301
    x2 = jax.random.normal(kx2, (B2, K), dtype=jnp.float32)
    y2 = jax.random.randint(ky2, (B2,), 0, NUM_CLASSES, dtype=jnp.int32)
    loss2 = focal_ordinal_loss(x2, y2, block_cols=128)
    jax.block_until_ready(loss2)
    ref2 = _reference(x2, y2)
    assert jnp.allclose(loss2, ref2, rtol=1e-4, atol=1e-4), (loss2, ref2)

    print("KERNEL_OK")
</pallas_src>

<mosaic_0001>
module attributes {stable_mosaic.version = 11 : i64} {
  func.func @_focal_ordinal_kernel(%arg0: i32, %arg1: memref<8x4xf32, #tpu.memory_space<vmem>>, %arg2: memref<1x1x128xf32, #tpu.memory_space<vmem>>) attributes {dimension_semantics = [#tpu.dimension_semantics<parallel>], iteration_bounds = array<i64: 1>, scalar_prefetch = 0 : i64, scratch_operands = 0 : i64, tpu.core_type = #tpu.core_type<tc>, window_params = [{transform_indices = @transform_0, window_bounds = array<i64: 8, 4>}, {transform_indices = @transform_1, window_bounds = array<i64: 1, 1, 128>}]} {
    %c0 = arith.constant 0 : index
    %c0_0 = arith.constant 0 : index
    %0 = vector.load %arg1[%c0, %c0_0] : memref<8x4xf32, #tpu.memory_space<vmem>>, vector<3x4xf32>
    %c3 = arith.constant 3 : index
    %c0_1 = arith.constant 0 : index
    %1 = vector.load %arg1[%c3, %c0_1] : memref<8x4xf32, #tpu.memory_space<vmem>>, vector<1x4xf32>
    %2 = tpu.iota {dimensions = array<i32: 0>} : vector<3x4xi32>
    %3 = arith.sitofp %2 : vector<3x4xi32> to vector<3x4xf32>
    %4 = vector.broadcast %1 : vector<1x4xf32> to vector<3x4xf32>
    %5 = arith.cmpf olt, %3, %4 : vector<3x4xf32>
    %cst = arith.constant 1.000000e+00 : f32
    %6 = vector.broadcast %cst : f32 to vector<3x4xf32>
    %7 = arith.subf %6, %0 : vector<3x4xf32>
    %8 = arith.mulf %7, %7 : vector<3x4xf32>
    %9 = arith.mulf %0, %0 : vector<3x4xf32>
    %10 = arith.select %5, %8, %9 : vector<3x4xi1>, vector<3x4xf32>
    %cst_2 = arith.constant dense<0xFF800000> : vector<4xf32>
    %11 = vector.multi_reduction <maximumf>, %10, %cst_2 [0] : vector<3x4xf32> to vector<4xf32>
    %12 = vector.shape_cast %11 : vector<4xf32> to vector<1x4xf32>
    %cst_3 = arith.constant 0.000000e+00 : f32
    %13 = vector.broadcast %cst_3 : f32 to vector<3x4xf32>
    %14 = arith.maximumf %0, %13 : vector<3x4xf32>
    %15 = math.absf %0 : vector<3x4xf32>
    %cst_4 = arith.constant 0.000000e+00 : f32
    %16 = vector.broadcast %cst_4 : f32 to vector<3x4xf32>
    %17 = arith.subf %16, %15 : vector<3x4xf32>
    %18 = math.exp %17 : vector<3x4xf32>
    %19 = math.log1p %18 : vector<3x4xf32>
    %20 = arith.addf %14, %19 : vector<3x4xf32>
    %21 = arith.subf %20, %0 : vector<3x4xf32>
    %cst_5 = arith.constant 7.500000e-01 : f32
    %22 = vector.broadcast %cst_5 : f32 to vector<3x4xf32>
    %23 = arith.mulf %22, %21 : vector<3x4xf32>
    %cst_6 = arith.constant 2.500000e-01 : f32
    %24 = vector.broadcast %cst_6 : f32 to vector<3x4xf32>
    %25 = arith.mulf %24, %20 : vector<3x4xf32>
    %26 = arith.select %5, %23, %25 : vector<3x4xi1>, vector<3x4xf32>
    %cst_7 = arith.constant dense<0.000000e+00> : vector<4xf32>
    %27 = vector.multi_reduction <add>, %26, %cst_7 [0] : vector<3x4xf32> to vector<4xf32>
    %28 = vector.shape_cast %27 : vector<4xf32> to vector<1x4xf32>
    %c4 = arith.constant 4 : index
    %c0_8 = arith.constant 0 : index
    %29 = vector.load %arg1[%c4, %c0_8] : memref<8x4xf32, #tpu.memory_space<vmem>>, vector<3x4xf32>
    %c7 = arith.constant 7 : index
    %c0_9 = arith.constant 0 : index
    %30 = vector.load %arg1[%c7, %c0_9] : memref<8x4xf32, #tpu.memory_space<vmem>>, vector<1x4xf32>
    %31 = tpu.iota {dimensions = array<i32: 0>} : vector<3x4xi32>
    %32 = arith.sitofp %31 : vector<3x4xi32> to vector<3x4xf32>
    %33 = vector.broadcast %30 : vector<1x4xf32> to vector<3x4xf32>
    %34 = arith.cmpf olt, %32, %33 : vector<3x4xf32>
    %cst_10 = arith.constant 1.000000e+00 : f32
    %35 = vector.broadcast %cst_10 : f32 to vector<3x4xf32>
    %36 = arith.subf %35, %29 : vector<3x4xf32>
    %37 = arith.mulf %36, %36 : vector<3x4xf32>
    %38 = arith.mulf %29, %29 : vector<3x4xf32>
    %39 = arith.select %34, %37, %38 : vector<3x4xi1>, vector<3x4xf32>
    %cst_11 = arith.constant dense<0xFF800000> : vector<4xf32>
    %40 = vector.multi_reduction <maximumf>, %39, %cst_11 [0] : vector<3x4xf32> to vector<4xf32>
    %41 = vector.shape_cast %40 : vector<4xf32> to vector<1x4xf32>
    %cst_12 = arith.constant 0.000000e+00 : f32
    %42 = vector.broadcast %cst_12 : f32 to vector<3x4xf32>
    %43 = arith.maximumf %29, %42 : vector<3x4xf32>
    %44 = math.absf %29 : vector<3x4xf32>
    %cst_13 = arith.constant 0.000000e+00 : f32
    %45 = vector.broadcast %cst_13 : f32 to vector<3x4xf32>
    %46 = arith.subf %45, %44 : vector<3x4xf32>
    %47 = math.exp %46 : vector<3x4xf32>
    %48 = math.log1p %47 : vector<3x4xf32>
    %49 = arith.addf %43, %48 : vector<3x4xf32>
    %50 = arith.subf %49, %29 : vector<3x4xf32>
    %cst_14 = arith.constant 7.500000e-01 : f32
    %51 = vector.broadcast %cst_14 : f32 to vector<3x4xf32>
    %52 = arith.mulf %51, %50 : vector<3x4xf32>
    %cst_15 = arith.constant 2.500000e-01 : f32
    %53 = vector.broadcast %cst_15 : f32 to vector<3x4xf32>
    %54 = arith.mulf %53, %49 : vector<3x4xf32>
    %55 = arith.select %34, %52, %54 : vector<3x4xi1>, vector<3x4xf32>
    %cst_16 = arith.constant dense<0.000000e+00> : vector<4xf32>
    %56 = vector.multi_reduction <add>, %55, %cst_16 [0] : vector<3x4xf32> to vector<4xf32>
    %57 = vector.shape_cast %56 : vector<4xf32> to vector<1x4xf32>
    %58 = arith.addf %12, %41 : vector<1x4xf32>
    %59 = vector.shape_cast %58 : vector<1x4xf32> to vector<1x1x4xf32>
    %cst_17 = arith.constant dense<0.000000e+00> : vector<1xf32>
    %60 = vector.multi_reduction <add>, %59, %cst_17 [1, 2] : vector<1x1x4xf32> to vector<1xf32>
    %61 = vector.shape_cast %60 : vector<1xf32> to vector<1x1x1xf32>
    %62 = vector.extract %61[0, 0, 0] : f32 from vector<1x1x1xf32>
    %63 = arith.addf %28, %57 : vector<1x4xf32>
    %64 = vector.shape_cast %63 : vector<1x4xf32> to vector<1x1x4xf32>
    %cst_18 = arith.constant dense<0.000000e+00> : vector<1xf32>
    %65 = vector.multi_reduction <add>, %64, %cst_18 [1, 2] : vector<1x1x4xf32> to vector<1xf32>
    %66 = vector.shape_cast %65 : vector<1xf32> to vector<1x1x1xf32>
    %67 = vector.extract %66[0, 0, 0] : f32 from vector<1x1x1xf32>
    %68 = tpu.iota {dimensions = array<i32: 2>} : vector<1x1x128xi32>
    %c0_i32 = arith.constant 0 : i32
    %69 = vector.broadcast %c0_i32 : i32 to vector<1x1x128xi32>
    %70 = arith.cmpi eq, %68, %69 : vector<1x1x128xi32>
    %c1_i32 = arith.constant 1 : i32
    %71 = vector.broadcast %c1_i32 : i32 to vector<1x1x128xi32>
    %72 = arith.cmpi eq, %68, %71 : vector<1x1x128xi32>
    %cst_19 = arith.constant 0.000000e+00 : f32
    %73 = vector.broadcast %67 : f32 to vector<1x1x128xf32>
    %74 = vector.broadcast %cst_19 : f32 to vector<1x1x128xf32>
    %75 = arith.select %72, %73, %74 : vector<1x1x128xi1>, vector<1x1x128xf32>
    %76 = vector.broadcast %62 : f32 to vector<1x1x128xf32>
    %77 = arith.select %70, %76, %75 : vector<1x1x128xi1>, vector<1x1x128xf32>
    %c0_20 = arith.constant 0 : index
    %c0_21 = arith.constant 0 : index
    %c0_22 = arith.constant 0 : index
    %78 = vector.load %arg2[%c0_20, %c0_21, %c0_22] : memref<1x1x128xf32, #tpu.memory_space<vmem>>, vector<1x1x128xf32>
    tpu.vector_store %arg2[%c0_20, %c0_21, %c0_22], %77 {strides = array<i32>} : memref<1x1x128xf32, #tpu.memory_space<vmem>>, vector<1x1x128xf32>,
    return
  }
  func.func @transform_0(%arg0: i32) -> (i32, i32) {
    %c0_i32 = arith.constant 0 : i32
    %c0_i32_0 = arith.constant 0 : i32
    return %c0_i32, %arg0 : i32, i32
  }
  func.func @transform_1(%arg0: i32) -> (i32, i32, i32) {
    %c0_i32 = arith.constant 0 : i32
    %c0_i32_0 = arith.constant 0 : i32
    %c0_i32_1 = arith.constant 0 : i32
    return %arg0, %c0_i32, %c0_i32_0 : i32, i32, i32
  }
}

</mosaic_0001>

<bundles_post_ra>
// kernel: tpu_custom_call.1
= control target key start
LH: loop header
LB: loop body
LE: loop exit
PB: predicated region body
PF: predicated region fallthrough
CT: control target
= control target key end

     0   :  { %v11_v1 = vlaneseq  ;;  %s250_s0 = inlined_call_operand.vmem [shape: f32[8,4], index: 0, kind: input, shape index: {}]   ;;  %s251_s1 = inlined_call_operand.hbm [shape: f32[1,1,128], index: 1, kind: output, shape index: {}]  }
   0x1   :  { %v198_v0 = vld [vmem:[%s250_s0] sm:$0x7]  ;;  %v148_v2 = vld [vmem:[%s250_s0 + $0x3] ss:$0 sm:$0xff]  ;;  %v208_v5 = vld [vmem:[%s250_s0 + $0x4] sm:$0x7] }
   0x2   :  { %v16_v3 = vsub.f32 1.0, %v198_v0  ;;  %v29_v4 = vand.u32 2147483647, %v198_v0  ;;  %v12_v6 = vshrl.u32 %v11_v1, 7  ;;  %v18_v7 = vmul.f32 %v198_v0, %v198_v0  ;;  %v149_v8 = vld [vmem:[%s250_s0 + $0x7] ss:$0 sm:$0xff] }
   0x3   :  { %v58_v9 = vsub.f32 1.0, %v208_v5  ;;  %v60_v12 = vmul.f32 %v208_v5, %v208_v5  ;;  %v70_v13 = vand.u32 2147483647, %v208_v5 }
   0x4   :  { %v17_v10 = vmul.f32 %v16_v3, %v16_v3  ;;  %v30_v11 = vsub.f32 0.0, %v29_v4 }
   0x5   :  { %6 = vsyncpa [#allocation3], 0  ;;  %v13_v14 = vcvt.s32.f32 %v12_v6  ;;  %v59_v15 = vmul.f32 %v58_v9, %v58_v9  ;;  %vm20_vm0 = vcmask 26624   ;;  %v71_v17 = vsub.f32 0.0, %v70_v13  ;;  %s184_s0 = smov [#allocation2]   ;;  %s134_s18 = sshll.u32 %s251_s1, 4  ;;  %s135_s18 = int_to_ptr.hbm [resolvable:$true] %s134_s18 }
   0x6   :  { %v31_v16 = vmul.f32 1.442695, %v30_v11  ;;  %vm96_vm3 = vcmask 24576   ;;  %v28_v50 = vmax.f32 %v198_v0, 0.0  ;;  %v69_v55 = vmax.f32 %v208_v5, 0.0  ;;  %s132_s14 = sshll.u32 %s184_s0, 4  ;;  %s133_s14 = int_to_ptr.vmem [resolvable:$true] %s132_s14 }
   0x7   :  { %vm220_vm1 = vcmp.lt.f32.partialorder %v13_v14, %v148_v2  ;;  %vm224_vm2 = vcmp.lt.f32.partialorder %v13_v14, %v149_v8  ;;  %v72_v22 = vmul.f32 1.442695, %v71_v17 }
   0x8   :  { %v19_v20 = vsel %vm220_vm1, %v17_v10, %v18_v7  ;;  %150 = vpow2.f32 %v31_v16  ;;  %v61_v21 = vsel %vm224_vm2, %v59_v15, %v60_v12 }
   0x9   :  { %v21_v23 = vsel %vm20_vm0, %v19_v20, -inf  ;;  %v62_v24 = vsel %vm20_vm0, %v61_v21, -inf  ;;  %152 = vpow2.f32 %v72_v22 }
   0xa   :  { %v22_v25 = vrot.slane %v21_v23, 4  ;;  %v63_v26 = vrot.slane %v62_v24, 4 }
   0xc   :  { %v23_v27 = vmax.f32 %v21_v23, %v22_v25  ;;  %v64_v28 = vmax.f32 %v62_v24, %v63_v26 }
   0xe   :  { %v151_v29 = vpop.eup %150  ;;  %v24_v30 = vrot.slane %v23_v27, 2  ;;  %v65_v31 = vrot.slane %v64_v28, 2 }
   0xf   :  { %v33_v32 = vadd.f32 1.0, %v151_v29  ;;  %v36_v33 = vmul.f32 -0.5, %v151_v29  ;;  %v153_v34 = vpop.eup %152  ;;  %v39_v42 = vand.u32 2147483647, %v151_v29 }
  0x10   :  { %v25_v35 = vmax.f32 %v23_v27, %v24_v30  ;;  %v66_v36 = vmax.f32 %v64_v28, %v65_v31  ;;  %v74_v37 = vadd.f32 1.0, %v153_v34  ;;  %v77_v41 = vmul.f32 -0.5, %v153_v34 }
  0x11   :  { %154 = vlog2.f32 %v33_v32  ;;  %v37_v40 = vadd.f32 1.0, %v36_v33  ;;  %v80_v46 = vand.u32 2147483647, %v153_v34  ;;  %vm40_vm4 = vcmp.lt.f32.partialorder %v39_v42, 0.0004427343 }
  0x12   :  { %v26_v38 = vrot.slane %v25_v35, 1  ;;  %v67_v39 = vrot.slane %v66_v36, 1  ;;  %156 = vlog2.f32 %v74_v37  ;;  %v78_v45 = vadd.f32 1.0, %v77_v41 }
  0x13   :  { %v38_v48 = vmul.f32 %v151_v29, %v37_v40  ;;  %vm81_vm5 = vcmp.lt.f32.partialorder %v80_v46, 0.0004427343 }
  0x14   :  { %v27_v43 = vmax.f32 %v25_v35, %v26_v38  ;;  %v68_v44 = vmax.f32 %v66_v36, %v67_v39  ;;  %v79_v53 = vmul.f32 %v153_v34, %v78_v45  ;;  %v119_v36 = vand.u32 127, %v11_v1 }
  0x16   :  { %v95_v47 = vadd.f32 %v68_v44, %v27_v43  ;;  %vm121_vm6 = vcmp.eq.s32.totalorder %v119_v36, 1  ;;  %vm120_vm7 = vcmp.eq.s32.totalorder %v119_v36, 0 }
  0x17   :  { %v155_v49 = vpop.eup %154 }
  0x18   :  { %v97_v51 = vsel %vm96_vm3, %v95_v47, 0.0  ;;  %v35_v52 = vmul.f32 0.6931472, %v155_v49  ;;  %v157_v54 = vpop.eup %156 }
  0x19   :  { %98 = vadd.xlane.f32.xlu0 %v97_v51  ;;  %v76_v57 = vmul.f32 0.6931472, %v157_v54 }
  0x1a   :  { %v41_v56 = vsel %vm40_vm4, %v38_v48, %v35_v52 }
  0x1b   :  { %v42_v58 = vadd.f32 %v41_v56, %v28_v50  ;;  %v82_v59 = vsel %vm81_vm5, %v79_v53, %v76_v57 }
  0x1c   :  { %v83_v62 = vadd.f32 %v82_v59, %v69_v55 }
  0x1d   :  { %v43_v60 = vsub.f32 %v42_v58, %v198_v0  ;;  %v45_v61 = vmul.f32 0.25, %v42_v58 }
  0x1e   :  { %v84_v2 = vsub.f32 %v83_v62, %v208_v5  ;;  %v86_v3 = vmul.f32 0.25, %v83_v62 }
  0x1f   :  { %v44_v63 = vmul.f32 0.75, %v43_v60 }
  0x20   :  { %v85_v6 = vmul.f32 0.75, %v84_v2 }
  0x21   :  { %v46_v4 = vsel %vm220_vm1, %v44_v63, %v45_v61 }
  0x22   :  { %v47_v7 = vsel %vm20_vm0, %v46_v4, 0.0  ;;  %v87_v9 = vsel %vm224_vm2, %v85_v6, %v86_v3 }
  0x23   :  { %v48_v8 = vrot.slane %v47_v7, 4  ;;  %v88_v10 = vsel %vm20_vm0, %v87_v9, 0.0 }
  0x24   :  { %v89_v0 = vrot.slane %v88_v10, 4 }
  0x25   :  { %v49_v11 = vadd.f32 %v48_v8, %v47_v7 }
  0x26   :  { %v90_v13 = vadd.f32 %v89_v0, %v88_v10 }
  0x27   :  { %v50_v12 = vrot.slane %v49_v11, 2 }
  0x28   :  { %v91_v15 = vrot.slane %v90_v13, 2 }
  0x29   :  { %v51_v14 = vadd.f32 %v50_v12, %v49_v11 }
  0x2a   :  { %v92_v16 = vadd.f32 %v91_v15, %v90_v13 }
  0x2b   :  { %v52_v5 = vrot.slane %v51_v14, 1 }
  0x2c   :  { %v93_v18 = vrot.slane %v92_v16, 1 }
  0x2d   :  { %v53_v17 = vadd.f32 %v52_v5, %v51_v14 }
  0x2e   :  { %v94_v20 = vadd.f32 %v93_v18, %v92_v16 }
  0x30   :  { %v107_v21 = vadd.f32 %v94_v20, %v53_v17 }
  0x32   :  { %v108_v22 = vsel %vm96_vm3, %v107_v21, 0.0 }
  0x33   :  { %109 = vadd.xlane.f32.xlu0 %v108_v22 }
  0x8c   :  { %v99_v23 = vpop.xlane.xlu0 %98 }
  0x8d   :  { %v100_v19 = vrot.slane %v99_v23, 4 }
  0x8f   :  { %v101_v24 = vadd.f32 %v100_v19, %v99_v23 }
  0x91   :  { %v102_v25 = vrot.slane %v101_v24, 2 }
  0x93   :  { %v103_v26 = vadd.f32 %v102_v25, %v101_v24 }
  0x95   :  { %v104_v27 = vrot.slane %v103_v26, 1 }
  0x97   :  { %v105_v28 = vadd.f32 %v104_v27, %v103_v26 }
  0x99   :  { %143 = vpush %v105_v28 }
  0xa6   :  { %v110_v29 = vpop.xlane.xlu0 %109 }
  0xa7   :  { %v111_v30 = vrot.slane %v110_v29, 4 }
  0xa9   :  { %v112_v31 = vadd.f32 %v111_v30, %v110_v29 }
  0xab   :  { %v113_v32 = vrot.slane %v112_v31, 2 }
  0xad   :  { %v114_v33 = vadd.f32 %v113_v32, %v112_v31 }
  0xaf   :  { %v115_v34 = vrot.slane %v114_v33, 1 }
  0xb1   :  { %v116_v35 = vadd.f32 %v115_v34, %v114_v33 }
  0xb3   :  { %145 = vpush %v116_v35 }
  0xca   :  { %s144_s15 = spop %143 }
  0xcb   :  { %v124_v38 = vstv %s144_s15 }
  0xe4   :  { %s146_s19 = spop %145 }
  0xe5   :  { %v122_v37 = vstv %s146_s19 }
  0xe6   :  { %v123_v39 = vsel %vm121_vm6, %v122_v37, 0.0 }
  0xe7   :  { %v125_v40 = vsel %vm120_vm7, %v124_v38, %v123_v39 }
  0xe8   :  { %126 = vst [vmem:[#allocation2] sm:$0x1] %v125_v40 }
  0xe9   :  { %137 = dma.vmem_to_hbm [thread:$0]  %s133_s14, 16, %s135_s18, [#allocation3]  }
  0xea   :  { %182 = dma.done.wait [#allocation3], 16  }
  0xeb   :  { %183 = vsyncadd [#allocation3], 4294967280 }
  0xec   :  { %142 = vsyncpa [#allocation3], 1 }

</bundles_post_ra>
